<compile_context>
chip_gen: v7x
topology: tpu7x:2x2x1
jax: 0.10.0
libtpu: 0.0.40
codegen_flags: <defaults>
</compile_context>

<pallas_src>
import jax
import jax.numpy as jnp
from jax.experimental import pallas as pl
from jax.experimental.pallas import tpu as pltpu


# ----------------------------------------------------------------------------
# Pallas kernel: BN + ReLU + fused bidirectional GRU, all resident in VMEM.
# ----------------------------------------------------------------------------
def bn_relu_gru_kernel(x_ref, gamma_ref, beta_ref, wih_ref, bih_ref,
                       whh_ref, bhh_ref, out_ref,
                       xgf_ref, xgb_ref, hf_ref, hb_ref):
    T, B, D = x_ref.shape
    H = whh_ref.shape[1]
    G = 3 * H

    # ---- BatchNorm1d (batch stats over (T, B) per channel D) + ReLU --------
    # One-pass stats, folded into a single per-channel scale/shift.
    x = x_ref[...]                                            # (T, B, D)
    inv_n = 1.0 / (T * B)
    mean = jnp.sum(x, axis=(0, 1), keepdims=True) * inv_n     # (1, 1, D)
    msq = jnp.sum(x * x, axis=(0, 1), keepdims=True) * inv_n
    var = msq - mean * mean                                   # biased variance
    gamma = gamma_ref[...].reshape(1, 1, D)
    beta = beta_ref[...].reshape(1, 1, D)
    scale = gamma * jax.lax.rsqrt(var + 1e-5)
    shift = beta - mean * scale
    xn = jnp.maximum(x * scale + shift, 0.0)                  # (T, B, D)

    # ---- input-side gate pre-activations for all timesteps (MXU) -----------
    # Time-major, so no in-kernel transpose is needed before the recurrence.
    # TODO(synk): optionally cast xn / wih to bfloat16 here (fp32 accumulate)
    # for 2x MXU rate on v6e/v7x when the accuracy budget allows.
    x2 = xn.reshape(T * B, D)
    xgf_ref[...] = (jnp.dot(x2, wih_ref[0], preferred_element_type=jnp.float32)
                    + bih_ref[0]).reshape(T, B, G)
    xgb_ref[...] = (jnp.dot(x2, wih_ref[1], preferred_element_type=jnp.float32)
                    + bih_ref[1]).reshape(T, B, G)

    whh = whh_ref[...]                                        # (2, H, 3H)
    bhh = bhh_ref[...]                                        # (2, 1, 3H)

    # ---- fused bidirectional recurrence: fwd chain at t=i, bwd at t=T-1-i ---
    def step(i, h):                                           # h: (2, B, H)
        tb = T - 1 - i
        xg = jnp.stack([xgf_ref[i], xgb_ref[tb]])             # (2, B, 3H)
        hg = jnp.einsum("dbh,dhg->dbg", h, whh,
                        preferred_element_type=jnp.float32) + bhh
        # Gate slices are lane slices; for H a multiple of 128 (real model
        # uses H=512) they are vreg-aligned and free.
        r = jax.nn.sigmoid(xg[:, :, :H] + hg[:, :, :H])
        z = jax.nn.sigmoid(xg[:, :, H:2 * H] + hg[:, :, H:2 * H])
        n = jnp.tanh(xg[:, :, 2 * H:] + r * hg[:, :, 2 * H:])
        h_new = (1.0 - z) * n + z * h                         # (2, B, H)
        hf_ref[i] = h_new[0]
        hb_ref[tb] = h_new[1]
        return h_new

    jax.lax.fori_loop(0, T, step, jnp.zeros((2, B, H), jnp.float32))

    # ---- assemble lane-dense (B, T, 2H) output inside the kernel ------------
    # (no post-kernel XLA concatenate/transpose -> no extra HBM round trip)
    out_f = jnp.transpose(hf_ref[...], (1, 0, 2))             # (B, T, H)
    out_b = jnp.transpose(hb_ref[...], (1, 0, 2))             # (B, T, H)
    out_ref[...] = jnp.concatenate([out_f, out_b], axis=-1)   # (B, T, 2H)


# ----------------------------------------------------------------------------
# Wrapper: parameter re-layout + pallas_call.  Output is (B, T, 2H) directly.
# ----------------------------------------------------------------------------
@jax.jit
def bn_relu_rnn_forward(x, params):
    B, T, D = x.shape
    H = params["weight_hh_f"].shape[1]          # weight_hh: (3H, H)
    G = 3 * H

    # Time-major input (one XLA layout op on the D-wide tensor) removes the
    # in-kernel transposes of the 3H-wide gate tensors.
    x_tm = jnp.transpose(x, (1, 0, 2))                        # (T, B, D)

    gamma = params["bn_gamma"].reshape(1, D)
    beta = params["bn_beta"].reshape(1, D)
    # PyTorch (3H, D)/(3H, H) -> matmul-friendly (D, 3H)/(H, 3H), stacked over
    # the direction axis d = {fwd, bwd} so the recurrence is one batched einsum.
    wih = jnp.stack([params["weight_ih_f"].T, params["weight_ih_b"].T])  # (2, D, 3H)
    whh = jnp.stack([params["weight_hh_f"].T, params["weight_hh_b"].T])  # (2, H, 3H)
    bih = jnp.stack([params["bias_ih_f"], params["bias_ih_b"]]).reshape(2, 1, G)
    bhh = jnp.stack([params["bias_hh_f"], params["bias_hh_b"]]).reshape(2, 1, G)

    # VMEM budget (everything resident; no grid).
    # TODO(synk): for large T*B*H (esp. v7x's 64 MiB VMEM) tile the
    # BN + input-matmul phase over T with a pipelined grid (or a second
    # pallas_call) and keep only the recurrence state resident; on v7x the two
    # directions could also be split across the 2 TensorCores.
    f32 = 4
    resident = f32 * (T * B * D                 # x
                      + 2 * T * B * G           # xg scratches
                      + 2 * T * B * H           # per-direction hidden scratch
                      + B * T * 2 * H           # output
                      + 2 * (D * G + H * G + 2 * G))   # weights / biases
    vmem_limit = int(min(max(2 * resident + (4 << 20), 16 << 20), 64 << 20))

    vmem = pl.BlockSpec(memory_space=pltpu.MemorySpace.VMEM)
    out = pl.pallas_call(
        bn_relu_gru_kernel,
        out_shape=jax.ShapeDtypeStruct((B, T, 2 * H), jnp.float32),
        in_specs=[vmem] * 7,
        out_specs=vmem,
        scratch_shapes=[pltpu.VMEM((T, B, G), jnp.float32),
                        pltpu.VMEM((T, B, G), jnp.float32),
                        pltpu.VMEM((T, B, H), jnp.float32),
                        pltpu.VMEM((T, B, H), jnp.float32)],
        compiler_params=pltpu.CompilerParams(vmem_limit_bytes=vmem_limit),
    )(x_tm, gamma, beta, wih, bih, whh, bhh)
    return out                                                # (B, T, 2H)


# ----------------------------------------------------------------------------
# Pure-JAX reference (PyTorch GRU/BN semantics) for validation.
# ----------------------------------------------------------------------------
def reference_forward(x, params):
    B, T, D = x.shape
    H = params["weight_hh_f"].shape[1]

    mean = jnp.mean(x, axis=(0, 1), keepdims=True)
    var = jnp.mean(jnp.square(x - mean), axis=(0, 1), keepdims=True)
    xn = (x - mean) / jnp.sqrt(var + 1e-5)
    xn = xn * params["bn_gamma"] + params["bn_beta"]
    xn = jnp.maximum(xn, 0.0)

    def gru_dir(xseq, wih, whh, bih, bhh):
        def step(h, xt):
            xg = xt @ wih.T + bih
            hg = h @ whh.T + bhh
            r = jax.nn.sigmoid(xg[:, :H] + hg[:, :H])
            z = jax.nn.sigmoid(xg[:, H:2 * H] + hg[:, H:2 * H])
            n = jnp.tanh(xg[:, 2 * H:] + r * hg[:, 2 * H:])
            h_new = (1.0 - z) * n + z * h
            return h_new, h_new
        _, ys = jax.lax.scan(step, jnp.zeros((B, H), jnp.float32),
                             jnp.transpose(xseq, (1, 0, 2)))
        return jnp.transpose(ys, (1, 0, 2))

    out_f = gru_dir(xn, params["weight_ih_f"], params["weight_hh_f"],
                    params["bias_ih_f"], params["bias_hh_f"])
    out_b = gru_dir(xn[:, ::-1], params["weight_ih_b"], params["weight_hh_b"],
                    params["bias_ih_b"], params["bias_hh_b"])[:, ::-1]
    return jnp.concatenate([out_f, out_b], axis=-1)


def init_params(key, input_size, hidden):
    """Deterministic synthetic parameters, PyTorch shapes / init style."""
    k = 1.0 / jnp.sqrt(hidden)
    keys = jax.random.split(key, 8)
    u = lambda kk, shape: jax.random.uniform(kk, shape, jnp.float32, -k, k)
    return {
        "bn_gamma": jnp.ones((input_size,), jnp.float32),
        "bn_beta": jnp.zeros((input_size,), jnp.float32),
        # forward direction
        "weight_ih_f": u(keys[0], (3 * hidden, input_size)),
        "weight_hh_f": u(keys[1], (3 * hidden, hidden)),
        "bias_ih_f": u(keys[2], (3 * hidden,)),
        "bias_hh_f": u(keys[3], (3 * hidden,)),
        # reverse direction
        "weight_ih_b": u(keys[4], (3 * hidden, input_size)),
        "weight_hh_b": u(keys[5], (3 * hidden, hidden)),
        "bias_ih_b": u(keys[6], (3 * hidden,)),
        "bias_hh_b": u(keys[7], (3 * hidden,)),
    }


if __name__ == "__main__":
    B, T, D, H = 2, 8, 16, 32   # batch, seq, input_size, hidden_state_dim

    key = jax.random.PRNGKey(0)
    kx, kp = jax.random.split(key)
    x = jax.random.normal(kx, (B, T, D), jnp.float32)
    params = init_params(kp, D, H)

    out = bn_relu_rnn_forward(x, params)
    out = jax.block_until_ready(out)

    ref = reference_forward(x, params)
    assert out.shape == (B, T, 2 * H), out.shape
    assert jnp.allclose(out, ref, rtol=1e-4, atol=2e-5), (
        float(jnp.max(jnp.abs(out - ref))))

    print("KERNEL_OK")
</pallas_src>

<mosaic_0001>
module attributes {stable_mosaic.version = 11 : i64} {
  func.func @bn_relu_gru_kernel(%arg0: memref<8x2x16xf32, #tpu.memory_space<vmem>>, %arg1: memref<1x16xf32, #tpu.memory_space<vmem>>, %arg2: memref<1x16xf32, #tpu.memory_space<vmem>>, %arg3: memref<2x16x96xf32, #tpu.memory_space<vmem>>, %arg4: memref<2x1x96xf32, #tpu.memory_space<vmem>>, %arg5: memref<2x32x96xf32, #tpu.memory_space<vmem>>, %arg6: memref<2x1x96xf32, #tpu.memory_space<vmem>>, %arg7: memref<2x8x64xf32, #tpu.memory_space<vmem>>, %arg8: memref<8x2x96xf32, #tpu.memory_space<vmem>>, %arg9: memref<8x2x96xf32, #tpu.memory_space<vmem>>, %arg10: memref<8x2x32xf32, #tpu.memory_space<vmem>>, %arg11: memref<8x2x32xf32, #tpu.memory_space<vmem>>) attributes {dimension_semantics = [], scalar_prefetch = 0 : i64, scratch_operands = 4 : i64, tpu.core_type = #tpu.core_type<tc>} {
    %c0 = arith.constant 0 : index
    %c0_0 = arith.constant 0 : index
    %c0_1 = arith.constant 0 : index
    %0 = vector.load %arg0[%c0, %c0_0, %c0_1] : memref<8x2x16xf32, #tpu.memory_space<vmem>>, vector<8x2x16xf32>
    %cst = arith.constant dense<0.000000e+00> : vector<16xf32>
    %1 = vector.multi_reduction <add>, %0, %cst [0, 1] : vector<8x2x16xf32> to vector<16xf32>
    %2 = vector.shape_cast %1 : vector<16xf32> to vector<1x1x16xf32>
    %cst_2 = arith.constant 6.250000e-02 : f32
    %3 = vector.broadcast %cst_2 : f32 to vector<1x1x16xf32>
    %4 = arith.mulf %2, %3 : vector<1x1x16xf32>
    %5 = arith.mulf %0, %0 : vector<8x2x16xf32>
    %cst_3 = arith.constant dense<0.000000e+00> : vector<16xf32>
    %6 = vector.multi_reduction <add>, %5, %cst_3 [0, 1] : vector<8x2x16xf32> to vector<16xf32>
    %7 = vector.shape_cast %6 : vector<16xf32> to vector<1x1x16xf32>
    %cst_4 = arith.constant 6.250000e-02 : f32
    %8 = vector.broadcast %cst_4 : f32 to vector<1x1x16xf32>
    %9 = arith.mulf %7, %8 : vector<1x1x16xf32>
    %10 = arith.mulf %4, %4 : vector<1x1x16xf32>
    %11 = arith.subf %9, %10 : vector<1x1x16xf32>
    %c0_5 = arith.constant 0 : index
    %c0_6 = arith.constant 0 : index
    %12 = vector.load %arg1[%c0_5, %c0_6] : memref<1x16xf32, #tpu.memory_space<vmem>>, vector<1x16xf32>
    %13 = vector.shape_cast %12 : vector<1x16xf32> to vector<1x1x16xf32>
    %c0_7 = arith.constant 0 : index
    %c0_8 = arith.constant 0 : index
    %14 = vector.load %arg2[%c0_7, %c0_8] : memref<1x16xf32, #tpu.memory_space<vmem>>, vector<1x16xf32>
    %15 = vector.shape_cast %14 : vector<1x16xf32> to vector<1x1x16xf32>
    %cst_9 = arith.constant 9.99999974E-6 : f32
    %16 = vector.broadcast %cst_9 : f32 to vector<1x1x16xf32>
    %17 = arith.addf %11, %16 : vector<1x1x16xf32>
    %18 = math.rsqrt %17 : vector<1x1x16xf32>
    %19 = arith.mulf %13, %18 : vector<1x1x16xf32>
    %20 = arith.mulf %4, %19 : vector<1x1x16xf32>
    %21 = arith.subf %15, %20 : vector<1x1x16xf32>
    %22 = vector.broadcast %19 : vector<1x1x16xf32> to vector<8x2x16xf32>
    %23 = arith.mulf %0, %22 : vector<8x2x16xf32>
    %24 = vector.broadcast %21 : vector<1x1x16xf32> to vector<8x2x16xf32>
    %25 = arith.addf %23, %24 : vector<8x2x16xf32>
    %cst_10 = arith.constant 0.000000e+00 : f32
    %26 = vector.broadcast %cst_10 : f32 to vector<8x2x16xf32>
    %27 = arith.maximumf %25, %26 : vector<8x2x16xf32>
    %28 = vector.shape_cast %27 : vector<8x2x16xf32> to vector<16x16xf32>
    %c0_11 = arith.constant 0 : index
    %c0_12 = arith.constant 0 : index
    %c0_13 = arith.constant 0 : index
    %29 = vector.load %arg3[%c0_11, %c0_12, %c0_13] : memref<2x16x96xf32, #tpu.memory_space<vmem>>, vector<1x16x96xf32>
    %30 = vector.shape_cast %29 : vector<1x16x96xf32> to vector<16x96xf32>
    %cst_14 = arith.constant dense<0.000000e+00> : vector<16x96xf32>
    %31 = tpu.matmul %28, %30, %cst_14 {dimension_numbers = #tpu.dot_dimension_numbers<[1], [0], [0], [1], [0, 0, 1, 1], [], []>} : vector<16x16xf32>, vector<16x96xf32>, vector<16x96xf32> -> vector<16x96xf32>
    %c0_15 = arith.constant 0 : index
    %c0_16 = arith.constant 0 : index
    %c0_17 = arith.constant 0 : index
    %32 = vector.load %arg4[%c0_15, %c0_16, %c0_17] : memref<2x1x96xf32, #tpu.memory_space<vmem>>, vector<1x1x96xf32>
    %33 = vector.shape_cast %32 : vector<1x1x96xf32> to vector<1x96xf32>
    %34 = vector.broadcast %33 : vector<1x96xf32> to vector<16x96xf32>
    %35 = arith.addf %31, %34 : vector<16x96xf32>
    %36 = vector.shape_cast %35 : vector<16x96xf32> to vector<8x2x96xf32>
    %c0_18 = arith.constant 0 : index
    %c0_19 = arith.constant 0 : index
    %c0_20 = arith.constant 0 : index
    %37 = vector.load %arg8[%c0_18, %c0_19, %c0_20] : memref<8x2x96xf32, #tpu.memory_space<vmem>>, vector<8x2x96xf32>
    tpu.vector_store %arg8[%c0_18, %c0_19, %c0_20], %36 {strides = array<i32>} : memref<8x2x96xf32, #tpu.memory_space<vmem>>, vector<8x2x96xf32>,
    %c1 = arith.constant 1 : index
    %c0_21 = arith.constant 0 : index
    %c0_22 = arith.constant 0 : index
    %38 = vector.load %arg3[%c1, %c0_21, %c0_22] : memref<2x16x96xf32, #tpu.memory_space<vmem>>, vector<1x16x96xf32>
    %39 = vector.shape_cast %38 : vector<1x16x96xf32> to vector<16x96xf32>
    %cst_23 = arith.constant dense<0.000000e+00> : vector<16x96xf32>
    %40 = tpu.matmul %28, %39, %cst_23 {dimension_numbers = #tpu.dot_dimension_numbers<[1], [0], [0], [1], [0, 0, 1, 1], [], []>} : vector<16x16xf32>, vector<16x96xf32>, vector<16x96xf32> -> vector<16x96xf32>
    %c1_24 = arith.constant 1 : index
    %c0_25 = arith.constant 0 : index
    %c0_26 = arith.constant 0 : index
    %41 = vector.load %arg4[%c1_24, %c0_25, %c0_26] : memref<2x1x96xf32, #tpu.memory_space<vmem>>, vector<1x1x96xf32>
    %42 = vector.shape_cast %41 : vector<1x1x96xf32> to vector<1x96xf32>
    %43 = vector.broadcast %42 : vector<1x96xf32> to vector<16x96xf32>
    %44 = arith.addf %40, %43 : vector<16x96xf32>
    %45 = vector.shape_cast %44 : vector<16x96xf32> to vector<8x2x96xf32>
    %c0_27 = arith.constant 0 : index
    %c0_28 = arith.constant 0 : index
    %c0_29 = arith.constant 0 : index
    %46 = vector.load %arg9[%c0_27, %c0_28, %c0_29] : memref<8x2x96xf32, #tpu.memory_space<vmem>>, vector<8x2x96xf32>
    tpu.vector_store %arg9[%c0_27, %c0_28, %c0_29], %45 {strides = array<i32>} : memref<8x2x96xf32, #tpu.memory_space<vmem>>, vector<8x2x96xf32>,
    %c0_30 = arith.constant 0 : index
    %c0_31 = arith.constant 0 : index
    %c0_32 = arith.constant 0 : index
    %47 = vector.load %arg5[%c0_30, %c0_31, %c0_32] : memref<2x32x96xf32, #tpu.memory_space<vmem>>, vector<2x32x96xf32>
    %c0_33 = arith.constant 0 : index
    %c0_34 = arith.constant 0 : index
    %c0_35 = arith.constant 0 : index
    %48 = vector.load %arg6[%c0_33, %c0_34, %c0_35] : memref<2x1x96xf32, #tpu.memory_space<vmem>>, vector<2x1x96xf32>
    %cst_36 = arith.constant 0.000000e+00 : f32
    %49 = vector.broadcast %cst_36 : f32 to vector<2x2x32xf32>
    %c0_i32 = arith.constant 0 : i32
    %c8_i32 = arith.constant 8 : i32
    %50 = arith.addi %c0_i32, %c8_i32 : i32
    %c1_i32 = arith.constant 1 : i32
    %51 = scf.for %arg12 = %c0_i32 to %50 step %c1_i32 iter_args(%arg13 = %49) -> (vector<2x2x32xf32>)  : i32 {
      %c7_i32 = arith.constant 7 : i32
      %58 = arith.subi %c7_i32, %arg12 : i32
      %59 = arith.index_cast %arg12 : i32 to index
      %c0_47 = arith.constant 0 : index
      %c0_48 = arith.constant 0 : index
      %60 = vector.load %arg8[%59, %c0_47, %c0_48] : memref<8x2x96xf32, #tpu.memory_space<vmem>>, vector<1x2x96xf32>
      %61 = vector.shape_cast %60 : vector<1x2x96xf32> to vector<2x96xf32>
      %62 = arith.index_cast %58 : i32 to index
      %c0_49 = arith.constant 0 : index
      %c0_50 = arith.constant 0 : index
      %63 = vector.load %arg9[%62, %c0_49, %c0_50] : memref<8x2x96xf32, #tpu.memory_space<vmem>>, vector<1x2x96xf32>
      %64 = vector.shape_cast %63 : vector<1x2x96xf32> to vector<2x96xf32>
      %65 = vector.shape_cast %61 : vector<2x96xf32> to vector<1x2x96xf32>
      %66 = vector.shape_cast %64 : vector<2x96xf32> to vector<1x2x96xf32>
      %67 = tpu.concatenate %65, %66 in 0 : vector<1x2x96xf32>, vector<1x2x96xf32> -> vector<2x2x96xf32>
      "tpu.trace_start"() <{level = 10 : i32, message = "dbh,dhg->dbg"}> : () -> ()
      %cst_51 = arith.constant dense<0.000000e+00> : vector<2x2x96xf32>
      %68 = tpu.matmul %arg13, %47, %cst_51 {dimension_numbers = #tpu.dot_dimension_numbers<[2], [1], [1], [2], [0, 0, 0, 1, 1, 2], [0], [0]>} : vector<2x2x32xf32>, vector<2x32x96xf32>, vector<2x2x96xf32> -> vector<2x2x96xf32>
      "tpu.trace_stop"() : () -> ()
      %69 = vector.broadcast %48 : vector<2x1x96xf32> to vector<2x2x96xf32>
      %70 = arith.addf %68, %69 : vector<2x2x96xf32>
      %71 = vector.extract_strided_slice %67 {offsets = [0, 0, 0], sizes = [2, 2, 32], strides = [1, 1, 1]} : vector<2x2x96xf32> to vector<2x2x32xf32>
      %72 = vector.extract_strided_slice %70 {offsets = [0, 0, 0], sizes = [2, 2, 32], strides = [1, 1, 1]} : vector<2x2x96xf32> to vector<2x2x32xf32>
      %73 = arith.addf %71, %72 : vector<2x2x32xf32>
      %74 = arith.negf %73 : vector<2x2x32xf32>
      %75 = math.exp %74 : vector<2x2x32xf32>
      %cst_52 = arith.constant 1.000000e+00 : f32
      %76 = vector.broadcast %cst_52 : f32 to vector<2x2x32xf32>
      %77 = arith.addf %76, %75 : vector<2x2x32xf32>
      %78 = arith.divf %76, %77 : vector<2x2x32xf32>
      %79 = vector.extract_strided_slice %67 {offsets = [0, 0, 32], sizes = [2, 2, 32], strides = [1, 1, 1]} : vector<2x2x96xf32> to vector<2x2x32xf32>
      %80 = vector.extract_strided_slice %70 {offsets = [0, 0, 32], sizes = [2, 2, 32], strides = [1, 1, 1]} : vector<2x2x96xf32> to vector<2x2x32xf32>
      %81 = arith.addf %79, %80 : vector<2x2x32xf32>
      %82 = arith.negf %81 : vector<2x2x32xf32>
      %83 = math.exp %82 : vector<2x2x32xf32>
      %cst_53 = arith.constant 1.000000e+00 : f32
      %84 = vector.broadcast %cst_53 : f32 to vector<2x2x32xf32>
      %85 = arith.addf %84, %83 : vector<2x2x32xf32>
      %86 = arith.divf %84, %85 : vector<2x2x32xf32>
      %87 = vector.extract_strided_slice %67 {offsets = [0, 0, 64], sizes = [2, 2, 32], strides = [1, 1, 1]} : vector<2x2x96xf32> to vector<2x2x32xf32>
      %88 = vector.extract_strided_slice %70 {offsets = [0, 0, 64], sizes = [2, 2, 32], strides = [1, 1, 1]} : vector<2x2x96xf32> to vector<2x2x32xf32>
      %89 = arith.mulf %78, %88 : vector<2x2x32xf32>
      %90 = arith.addf %87, %89 : vector<2x2x32xf32>
      %91 = math.tanh %90 : vector<2x2x32xf32>
      %cst_54 = arith.constant 1.000000e+00 : f32
      %92 = vector.broadcast %cst_54 : f32 to vector<2x2x32xf32>
      %93 = arith.subf %92, %86 : vector<2x2x32xf32>
      %94 = arith.mulf %93, %91 : vector<2x2x32xf32>
      %95 = arith.mulf %86, %arg13 : vector<2x2x32xf32>
      %96 = arith.addf %94, %95 : vector<2x2x32xf32>
      %97 = vector.extract_strided_slice %96 {offsets = [0, 0, 0], sizes = [1, 2, 32], strides = [1, 1, 1]} : vector<2x2x32xf32> to vector<1x2x32xf32>
      %98 = vector.shape_cast %97 : vector<1x2x32xf32> to vector<2x32xf32>
      %99 = arith.index_cast %arg12 : i32 to index
      %c0_55 = arith.constant 0 : index
      %c0_56 = arith.constant 0 : index
      %100 = vector.load %arg10[%99, %c0_55, %c0_56] : memref<8x2x32xf32, #tpu.memory_space<vmem>>, vector<1x2x32xf32>
      %101 = vector.shape_cast %100 : vector<1x2x32xf32> to vector<2x32xf32>
      %102 = vector.shape_cast %98 : vector<2x32xf32> to vector<1x2x32xf32>
      tpu.vector_store %arg10[%99, %c0_55, %c0_56], %102 {strides = array<i32>} : memref<8x2x32xf32, #tpu.memory_space<vmem>>, vector<1x2x32xf32>,
      %103 = vector.extract_strided_slice %96 {offsets = [1, 0, 0], sizes = [1, 2, 32], strides = [1, 1, 1]} : vector<2x2x32xf32> to vector<1x2x32xf32>
      %104 = vector.shape_cast %103 : vector<1x2x32xf32> to vector<2x32xf32>
      %105 = arith.index_cast %58 : i32 to index
      %c0_57 = arith.constant 0 : index
      %c0_58 = arith.constant 0 : index
      %106 = vector.load %arg11[%105, %c0_57, %c0_58] : memref<8x2x32xf32, #tpu.memory_space<vmem>>, vector<1x2x32xf32>
      %107 = vector.shape_cast %106 : vector<1x2x32xf32> to vector<2x32xf32>
      %108 = vector.shape_cast %104 : vector<2x32xf32> to vector<1x2x32xf32>
      tpu.vector_store %arg11[%105, %c0_57, %c0_58], %108 {strides = array<i32>} : memref<8x2x32xf32, #tpu.memory_space<vmem>>, vector<1x2x32xf32>,
      scf.yield %96 : vector<2x2x32xf32>
    }
    %c8_i32_37 = arith.constant 8 : i32
    %c0_38 = arith.constant 0 : index
    %c0_39 = arith.constant 0 : index
    %c0_40 = arith.constant 0 : index
    %52 = vector.load %arg10[%c0_38, %c0_39, %c0_40] : memref<8x2x32xf32, #tpu.memory_space<vmem>>, vector<8x2x32xf32>
    %53 = tpu.transpose %52, [1, 0, 2] : vector<8x2x32xf32> -> vector<2x8x32xf32>
    %c0_41 = arith.constant 0 : index
    %c0_42 = arith.constant 0 : index
    %c0_43 = arith.constant 0 : index
    %54 = vector.load %arg11[%c0_41, %c0_42, %c0_43] : memref<8x2x32xf32, #tpu.memory_space<vmem>>, vector<8x2x32xf32>
    %55 = tpu.transpose %54, [1, 0, 2] : vector<8x2x32xf32> -> vector<2x8x32xf32>
    %56 = tpu.concatenate %53, %55 in 2 : vector<2x8x32xf32>, vector<2x8x32xf32> -> vector<2x8x64xf32>
    %c0_44 = arith.constant 0 : index
    %c0_45 = arith.constant 0 : index
    %c0_46 = arith.constant 0 : index
    %57 = vector.load %arg7[%c0_44, %c0_45, %c0_46] : memref<2x8x64xf32, #tpu.memory_space<vmem>>, vector<2x8x64xf32>
    tpu.vector_store %arg7[%c0_44, %c0_45, %c0_46], %56 {strides = array<i32>} : memref<2x8x64xf32, #tpu.memory_space<vmem>>, vector<2x8x64xf32>,
    return
  }
}

</mosaic_0001>

<bundles_post_ra>
// kernel: bn_relu_rnn_forward.1
= control target key start
LH: loop header
LB: loop body
LE: loop exit
PB: predicated region body
PF: predicated region fallthrough
CT: control target
= control target key end

     0   :  { %12 = vsyncpa [#allocation7], 0  ;;  %vm35_vm0 = vcmask 123904   ;;  %vm184_vm1 = vcmask 130048   ;;  %vm308_vm2 = vcmask 779264   ;;  %s1391_s0 = inlined_call_operand.vmem [shape: f32[8,2,16], index: 0, kind: input, shape index: {}]   ;;  %s1392_s1 = inlined_call_operand.vmem [shape: f32[1,16], index: 1, kind: input, shape index: {}]   ;;  %s1393_s2 = inlined_call_operand.vmem [shape: f32[1,16], index: 2, kind: input, shape index: {}]   ;;  %s1394_s3 = inlined_call_operand.vmem [shape: f32[2,16,96], index: 3, kind: input, shape index: {}]   ;;  %s1395_s4 = inlined_call_operand.vmem [shape: f32[2,1,96], index: 4, kind: input, shape index: {}]   ;;  %s1396_s5 = inlined_call_operand.vmem [shape: f32[2,32,96], index: 5, kind: input, shape index: {}]   ;;  %s1397_s6 = inlined_call_operand.vmem [shape: f32[2,1,96], index: 6, kind: input, shape index: {}]   ;;  %s1398_s7 = inlined_call_operand.hbm [shape: f32[2,8,64], index: 7, kind: output, shape index: {}]  }
   0x1   :  { %v133_v0 = vld [vmem:[%s1394_s3] sm:$0xff]  ;;  %v134_v1 = vld [vmem:[%s1394_s3 + $0x8] sm:$0xff]  ;;  %v876_v3 = vld [vmem:[%s1394_s3 + $0x10] sm:$0xff] }
   0x2   :  { %v944_v2 = vpack.c.bf16 %v134_v1, %v133_v0  ;;  %v877_v4 = vld [vmem:[%s1394_s3 + $0x18] sm:$0xff]  ;;  %v1143_v5 = vld [vmem:[%s1391_s0] sm:$0x3]  ;;  %v1148_v7 = vld [vmem:[%s1391_s0 + $0x2] sm:$0x3] }
   0x3   :  { %v948_v6 = vpack.c.bf16 %v877_v4, %v876_v3  ;;  %v1153_v8 = vld [vmem:[%s1391_s0 + $0x4] sm:$0x3]  ;;  %v1158_v9 = vld [vmem:[%s1391_s0 + $0x6] sm:$0x3]  ;;  %v58_v10 = vmul.f32 %v1143_v5, %v1143_v5  ;;  %v59_v11 = vmul.f32 %v1148_v7, %v1148_v7  ;;  %v1167_v12 = vld [vmem:[%s1391_s0 + $0x8] sm:$0x3] }
   0x4   :  { %945 = vmatprep.subr.bf16.mxu0 %v944_v2  ;;  %v36_v13 = vsel %vm35_vm0, %v1143_v5, 0.0  ;;  %v37_v14 = vsel %vm35_vm0, %v1148_v7, 0.0  ;;  %v39_v15 = vsel %vm35_vm0, %v1153_v8, 0.0  ;;  %v60_v16 = vmul.f32 %v1153_v8, %v1153_v8  ;;  %v1182_v19 = vld [vmem:[%s1391_s0 + $0xa] sm:$0x3] }
   0x5   :  { %949 = vmatprep.subr.bf16.mxu1 %v948_v6  ;;  %947 = vmatpush3.bf16.msra.mxu0 %v944_v2  ;;  %v38_v17 = vadd.f32 %v37_v14, %v36_v13  ;;  %v61_v18 = vmul.f32 %v1158_v9, %v1158_v9  ;;  %v41_v20 = vsel %vm35_vm0, %v1158_v9, 0.0  ;;  %v62_v22 = vmul.f32 %v1167_v12, %v1167_v12  ;;  %v1193_v25 = vld [vmem:[%s1391_s0 + $0xc] sm:$0x3]  ;;  %v34_v32 = vld [vmem:[%s1391_s0 + $0xe] sm:$0x3] }
   0x6   :  { %951 = vmatpush3.bf16.msra.mxu1 %v948_v6  ;;  %v66_v23 = vsel %vm35_vm0, %v58_v10, 0.0  ;;  %v67_v24 = vsel %vm35_vm0, %v59_v11, 0.0  ;;  %v43_v26 = vsel %vm35_vm0, %v1167_v12, 0.0  ;;  %v69_v28 = vsel %vm35_vm0, %v60_v16, 0.0  ;;  %v90_v11 = vld [vmem:[%s1392_s1] sm:$0x1] }
   0x7   :  { %v40_v21 = vadd.f32 %v39_v15, %v38_v17  ;;  %v68_v27 = vadd.f32 %v67_v24, %v66_v23  ;;  %v63_v30 = vmul.f32 %v1182_v19, %v1182_v19  ;;  %v71_v31 = vsel %vm35_vm0, %v61_v18, 0.0  ;;  %v91_v18 = vld [vmem:[%s1393_s2] sm:$0x1] }
   0x8   :  { %v45_v33 = vsel %vm35_vm0, %v1182_v19, 0.0  ;;  %v64_v36 = vmul.f32 %v1193_v25, %v1193_v25  ;;  %v73_v37 = vsel %vm35_vm0, %v62_v22, 0.0  ;;  %v47_v38 = vsel %vm35_vm0, %v1193_v25, 0.0 }
   0x9   :  { %v42_v29 = vadd.f32 %v41_v20, %v40_v21  ;;  %v70_v34 = vadd.f32 %v69_v28, %v68_v27  ;;  %v65_v41 = vmul.f32 %v34_v32, %v34_v32  ;;  %v75_v42 = vsel %vm35_vm0, %v63_v30, 0.0 }
   0xa   :  { %v49_v43 = vsel %vm35_vm0, %v34_v32, 0.0  ;;  %v77_v46 = vsel %vm35_vm0, %v64_v36, 0.0  ;;  %v98_v6 = vlaneseq  ;;  %v1077_v15 = vmov 1983009808  }
   0xb   :  { %v44_v35 = vadd.f32 %v43_v26, %v42_v29  ;;  %v72_v39 = vadd.f32 %v71_v31, %v70_v34  ;;  %v79_v49 = vsel %vm35_vm0, %v65_v41, 0.0  ;;  %v153_v16 = vunpack.c.l.s4 %v1077_v15 }
   0xc   :  { %v1215_v10 = vshrl.u32 %v98_v6, 7 }
   0xd   :  { %v46_v40 = vadd.f32 %v45_v33, %v44_v35  ;;  %v74_v44 = vadd.f32 %v73_v37, %v72_v39  ;;  %v154_v22 = vunpack.c.0.s8 %v153_v16 }
   0xe   :  { %v100_v13 = vsub.s32 0, %v1215_v10 }
   0xf   :  { %v48_v45 = vadd.f32 %v47_v38, %v46_v40  ;;  %v76_v47 = vadd.f32 %v75_v42, %v74_v44  ;;  %v1232_v35 = vsub.s32 %v154_v22, %v1215_v10 }
  0x11   :  { %v50_v48 = vadd.f32 %v49_v43, %v48_v45  ;;  %v78_v50 = vadd.f32 %v77_v46, %v76_v47 }
  0x13   :  { %v51_v51 = vrot.slane %v50_v48, 4  ;;  %v80_v52 = vadd.f32 %v79_v49, %v78_v50 }
  0x15   :  { %v52_v53 = vadd.f32 %v51_v51, %v50_v48  ;;  %v81_v54 = vrot.slane %v80_v52, 4 }
  0x17   :  { %v53_v55 = vrot.slane %v52_v53, 2  ;;  %v82_v56 = vadd.f32 %v81_v54, %v80_v52  ;;  %v1241_v54 = vld [vmem:[%s1396_s5] sm:$0xff] }
  0x19   :  { %v54_v57 = vadd.f32 %v53_v55, %v52_v53  ;;  %v83_v58 = vrot.slane %v82_v56, 2  ;;  %v1246_v55 = vld [vmem:[%s1396_s5 + $0x8] sm:$0xff] }
  0x1b   :  { %v55_v59 = vrot.slane %v54_v57, 1  ;;  %v84_v60 = vadd.f32 %v83_v58, %v82_v56  ;;  %v1251_v56 = vld [vmem:[%s1396_s5 + $0x10] sm:$0xff]  ;;  %v1261_v58 = vld [vmem:[%s1396_s5 + $0x20] sm:$0xff] }
  0x1d   :  { %v56_v61 = vadd.f32 %v55_v59, %v54_v57  ;;  %v85_v62 = vrot.slane %v84_v60, 1  ;;  %v1256_v57 = vld [vmem:[%s1396_s5 + $0x18] sm:$0xff]  ;;  %v1266_v59 = vld [vmem:[%s1396_s5 + $0x28] sm:$0xff] }
  0x1f   :  { %v57_v63 = vmul.f32 0.0625, %v56_v61  ;;  %v86_v0 = vadd.f32 %v85_v62, %v84_v60  ;;  %v1271_v60 = vld [vmem:[%s1396_s5 + $0x30] sm:$0xff]  ;;  %v1276_v61 = vld [vmem:[%s1396_s5 + $0x38] sm:$0xff]  ;;  %v1281_v62 = vld [vmem:[%s1397_s6] ss:$0 sm:$0xff] }
  0x21   :  { %v88_v1 = vmul.f32 %v57_v63, %v57_v63  ;;  %v87_v2 = vmul.f32 0.0625, %v86_v0  ;;  %v873_v0 = vld [vmem:[%s1395_s4] ss:$0 sm:$0xff] }
  0x23   :  { %v89_v3 = vsub.f32 %v87_v2, %v88_v1  ;;  %v879_v1 = vld [vmem:[%s1395_s4 + $0x1] ss:$0 sm:$0xff]  ;;  %s1322_s4 = smov 0  }
  0x25   :  { %v92_v4 = vadd.f32 1e-05, %v89_v3 }
  0x27   :  { %999 = vrsqrt.f32 %v92_v4 }
  0x31   :  { %v1000_v14 = vpop.eup %999 }
  0x32   :  { %v94_v17 = vmul.f32 %v1000_v14, %v90_v11 }
  0x34   :  { %v95_v20 = vmul.f32 %v94_v17, %v57_v63  ;;  %v101_v21 = vrot.slane %v94_v17, %v100_v13  ;;  %v1286_v63 = vld [vmem:[%s1397_s6 + $0x1] ss:$0 sm:$0xff] }
  0x36   :  { %v96_v23 = vsub.f32 %v91_v18, %v95_v20  ;;  %v103_v24 = vmul.f32 %v101_v21, %v1143_v5  ;;  %v104_v26 = vmul.f32 %v101_v21, %v1148_v7  ;;  %v105_v27 = vmul.f32 %v101_v21, %v1153_v8 }
  0x37   :  { %v106_v28 = vmul.f32 %v101_v21, %v1158_v9  ;;  %v107_v29 = vmul.f32 %v101_v21, %v1167_v12  ;;  %v108_v30 = vmul.f32 %v101_v21, %v1182_v19  ;;  %v109_v31 = vmul.f32 %v101_v21, %v1193_v25 }
  0x38   :  { %v115_v33 = vrot.slane %v96_v23, %v100_v13  ;;  %v110_v34 = vmul.f32 %v101_v21, %v34_v32 }
  0x3a   :  { %v117_v36 = vadd.f32 %v115_v33, %v103_v24  ;;  %v118_v37 = vadd.f32 %v115_v33, %v104_v26  ;;  %v119_v5 = vadd.f32 %v115_v33, %v105_v27  ;;  %v120_v38 = vadd.f32 %v115_v33, %v106_v28 }
  0x3b   :  { %v121_v7 = vadd.f32 %v115_v33, %v107_v29  ;;  %v122_v39 = vadd.f32 %v115_v33, %v108_v30  ;;  %v123_v8 = vadd.f32 %v115_v33, %v109_v31  ;;  %v124_v40 = vadd.f32 %v115_v33, %v110_v34 }
  0x3c   :  { %v125_v9 = vmax.f32 %v117_v36, 0.0  ;;  %v126_v41 = vmax.f32 %v118_v37, 0.0  ;;  %v127_v12 = vmax.f32 %v119_v5, 0.0  ;;  %v128_v42 = vmax.f32 %v120_v38, 0.0 }
  0x3d   :  { %v129_v19 = vmax.f32 %v121_v7, 0.0  ;;  %v130_v43 = vmax.f32 %v122_v39, 0.0  ;;  %v131_v25 = vmax.f32 %v123_v8, 0.0  ;;  %v132_v44 = vmax.f32 %v124_v40, 0.0 }
  0x3e   :  { %v150_v32 = vcombine.low %v125_v9, %v126_v41  ;;  %v151_v45 = vcombine.low %v127_v12, %v128_v42  ;;  %v1320_v7 = vmov 0.0  }
  0x3f   :  { %v167_v46 = vcombine.low %v129_v19, %v130_v43  ;;  %v168_v47 = vcombine.low %v131_v25, %v132_v44 }
  0x40   :  { %v158_v48 = vrot.slane %v150_v32, %v1232_v35  ;;  %v165_v49 = vrot.slane %v151_v45, %v1232_v35 }
  0x41   :  { %v175_v50 = vrot.slane %v167_v46, %v1232_v35  ;;  %v182_v51 = vrot.slane %v168_v47, %v1232_v35 }
  0x42   :  { %v166_v52 = vcombine.low %v158_v48, %v165_v49 }
  0x43   :  { %v183_v53 = vcombine.low %v175_v50, %v182_v51 }
  0x44   :  { %912 = vmatprep.mubr.msk.f32.mxu0 %vm184_vm1, %v166_v52  ;;  %919 = vmatprep.mubr.msk.f32.mxu1 %vm184_vm1, %v166_v52 }
  0x45   :  { %913 = vmatmul.mubr.msk.f32.vlgmr.msra.gmra.mrb[0].mxu0 %vm184_vm1, %v183_v53  ;;  %920 = vmatmul.mubr.msk.f32.vlgmr.msra.gmra.mrb[0].mxu1 %vm184_vm1, %v183_v53 }
 0x118   :  { %v914_v2 = vpop.f32.mrb[0].mxu0  ;;  %v921_v3 = vpop.f32.mrb[0].mxu1 }
 0x119   :  { %v261_v4 = vadd.f32 %v914_v2, %v873_v0  ;;  %v400_v6 = vadd.f32 %v921_v3, %v879_v1  ;;  %v255_v11 = vpop.f32.mrb[1].mxu0  ;;  %v394_v13 = vpop.f32.mrb[1].mxu1 }
 0x11a   :  { %v256_v14 = vadd.f32 %v873_v0, %v255_v11  ;;  %v395_v15 = vadd.f32 %v879_v1, %v394_v13 }
 0x11b   :  { %v283_v16 = vcombine.high %v261_v4, %v261_v4  ;;  %v290_v17 = vrot.slane %v261_v4, %v1232_v35  ;;  %v422_v18 = vcombine.high %v400_v6, %v400_v6  ;;  %v429_v20 = vrot.slane %v400_v6, %v1232_v35 }
 0x11c   :  { %v266_v21 = vcombine.high %v256_v14, %v256_v14  ;;  %v273_v22 = vrot.slane %v256_v14, %v1232_v35  ;;  %v405_v23 = vcombine.high %v395_v15, %v395_v15  ;;  %v412_v24 = vrot.slane %v395_v15, %v1232_v35 }
 0x11d   :  { %v297_v26 = vrot.slane %v283_v16, %v1232_v35  ;;  %v298_v27 = vcombine.high %v290_v17, %v290_v17  ;;  %313 = vst.msk [vmem:[#allocation2 + $0x8] sm:$0x3] %vm308_vm2, %v290_v17  ;;  %v436_v28 = vrot.slane %v422_v18, %v1232_v35  ;;  %v437_v29 = vcombine.high %v429_v20, %v429_v20 }
 0x11e   :  { %451 = vst.msk [vmem:[#allocation3 + $0x8] sm:$0x3] %vm308_vm2, %v429_v20  ;;  %v280_v30 = vrot.slane %v266_v21, %v1232_v35  ;;  %v281_v31 = vcombine.high %v273_v22, %v273_v22  ;;  %309 = vst.msk [vmem:[#allocation2] sm:$0x3] %vm308_vm2, %v273_v22  ;;  %v419_v33 = vrot.slane %v405_v23, %v1232_v35  ;;  %v1318_v35 = vmov 0.0  }
 0x11f   :  { %v420_v34 = vcombine.high %v412_v24, %v412_v24  ;;  %447 = vst.msk [vmem:[#allocation3] sm:$0x3] %vm308_vm2, %v412_v24  ;;  %v299_v36 = vcombine.high %v297_v26, %v297_v26  ;;  %314 = vst.msk [vmem:[#allocation2 + $0xa] sm:$0x3] %vm308_vm2, %v298_v27  ;;  %v438_v37 = vcombine.high %v436_v28, %v436_v28 }
 0x120   :  { %315 = vst.msk [vmem:[#allocation2 + $0xc] sm:$0x3] %vm308_vm2, %v297_v26  ;;  %452 = vst.msk [vmem:[#allocation3 + $0xa] sm:$0x3] %vm308_vm2, %v437_v29  ;;  %v282_v5 = vcombine.high %v280_v30, %v280_v30  ;;  %v421_v38 = vcombine.high %v419_v33, %v419_v33 }
 0x121   :  { %453 = vst.msk [vmem:[#allocation3 + $0xc] sm:$0x3] %vm308_vm2, %v436_v28  ;;  %310 = vst.msk [vmem:[#allocation2 + $0x2] sm:$0x3] %vm308_vm2, %v281_v31 }
 0x122   :  { %311 = vst.msk [vmem:[#allocation2 + $0x4] sm:$0x3] %vm308_vm2, %v280_v30  ;;  %448 = vst.msk [vmem:[#allocation3 + $0x2] sm:$0x3] %vm308_vm2, %v420_v34 }
 0x123   :  { %449 = vst.msk [vmem:[#allocation3 + $0x4] sm:$0x3] %vm308_vm2, %v419_v33  ;;  %316 = vst.msk [vmem:[#allocation2 + $0xe] sm:$0x3] %vm308_vm2, %v299_v36 }
 0x124   :  { %454 = vst.msk [vmem:[#allocation3 + $0xe] sm:$0x3] %vm308_vm2, %v438_v37  ;;  %312 = vst.msk [vmem:[#allocation2 + $0x6] sm:$0x3] %vm308_vm2, %v282_v5 }
 0x125   :  { %450 = vst.msk [vmem:[#allocation3 + $0x6] sm:$0x3] %vm308_vm2, %v421_v38 }
 0x126 LB: > { %v953_v39 = vpack.c.bf16 %v1246_v55, %v1241_v54  ;;  %v1078_v8 = vmov 0.0|0.0   ;;  %v959_v40 = vpack.c.bf16 %v1266_v59, %v1261_v58  ;;  %s1079_s5 = smov 96   ;;  %v956_v9 = vpack.c.bf16 %v1256_v57, %v1251_v56  ;;  %s1082_s6 = smov 64   ;;  %s1075_s4 = sphi %s1322_s4, %s470_s4   ;;  %v1071_v7 = vphi %v1320_v7, %v693_v7   ;;  %v1067_v35 = vphi %v1318_v35, %v694_v35  }
 0x127   : > { %952 = vmatprep.subr.bf16.mxu0 %v1078_v8  ;;  %958 = vmatprep.subr.bf16.mxu1 %v1078_v8  ;;  %v962_v41 = vpack.c.bf16 %v1276_v61, %v1271_v60  ;;  %vm1080_vm3 = vmmov 0   ;;  %v1081_v12 = vmov 0.0   ;;  %vm495_vm4 = vcmask 261120   ;;  %s882_s24 = sshll.u32 %s1075_s4, 1  ;;  %s473_s25 = ssub.s32 7, %s1075_s4 }
 0x128   : > { %493 = vrot.lane.b32.xlu0 %v1071_v7, %s1079_s5  ;;  %954 = vmatpush3.bf16.msra.mxu0 %v953_v39  ;;  %s1353_s26 = sshll.u32 %s473_s25, 1  ;;  %s475_s1 = scalar_lea.vmem [#allocation2], %s882_s24  ;;  %vm700_vm5 = vcmask 254976  }
 0x129   : > { %955 = vmatprep.subr.bf16.mxu0 %v1078_v8  ;;  %960 = vmatpush3.bf16.msra.mxu1 %v959_v40  ;;  %s478_s2 = scalar_lea.vmem [#allocation3], %s1353_s26  ;;  %s699_s27 = scalar_lea.vmem [#allocation4], %s882_s24 }
 0x12a   : > { %930 = vmatprep.mubr.msk.f32.mxu0 %vm1080_vm3, %v1081_v12  ;;  %961 = vmatprep.subr.bf16.mxu1 %v1078_v8  ;;  %s706_s28 = scalar_lea.vmem [#allocation5], %s1353_s26  ;;  %s470_s4 = sadd.s32 1, %s1075_s4  }
 0x12b   : > { %941 = vmatprep.mubr.msk.f32.mxu1 %vm1080_vm3, %v1081_v12  ;;  %v476_v47 = vld [vmem:[%s475_s1] sm:$0x3]  ;;  %p467_p0 = scmp.ge.s32.totalorder %s470_s4, 8  }
 0x12c   : > { %569 = vrot.lane.b32.xlu0 %v1067_v35, %s1079_s5  ;;  %957 = vmatpush3.bf16.msra.mxu0 %v956_v9  ;;  %v479_v49 = vld [vmem:[%s478_s2] sm:$0x3]  ;;  %v1083_v34 = vmov (%p467_p0), 1934713408   ;;  %s1084_s29 = smov (%p467_p0), 32   ;;  %vm835_vm6 = vcmask (%p467_p0), 523264  }
 0x12d   : > { %963 = vmatpush3.bf16.msra.mxu1 %v962_v41  ;;  %v750_v36 = vunpack.c.l.s4 (%p467_p0), %v1083_v34  ;;  %s1085_s30 = smov (%p467_p0), [#allocation6]  }
 0x12e   :  { %s843_s8 = sshll.u32 (%p467_p0), %s1085_s30, 4  ;;  %s844_s8 = int_to_ptr.vmem [resolvable:$true] %s843_s8 }
 0x12f   :  { %v751_v37 = vunpack.c.0.s8 (%p467_p0), %v750_v36  ;;  %s1029_s9 = scalar_lea.vmem (%p467_p0), %s844_s8, 256  ;;  %p1034_p2 = scmp.lt.s32.totalorder (%p467_p0), %s844_s8, %s844_s8 }
 0x130   :  { %p1030_p1 = scmp.ne.s32.totalorder (%p467_p0), %s844_s8, %s1029_s9  ;;  %p1035_p3 = scmp.lt.s32.totalorder (%p467_p0), %s1029_s9, %s1029_s9 }
 0x131   :  { %v754_v40 = vsub.s32 (%p467_p0), %v751_v37, %v1215_v10 }
 0x132   :  { %p1036_p4 = por (%p467_p0), %p1035_p3, %p1034_p2 }
 0x134   :  { %p1037_p5 = pnand (%p467_p0), %p1036_p4, %p1030_p1 }
 0x19a   : > { %v494_v42 = vpop.permute.xlu0 %493 }
 0x19b   : > { %931 = vmatmul.mubr.msk.f32.vlgmr.msra.gmra.mrb[0].mxu0 %vm495_vm4, %v494_v42 }
 0x19e   : > { %v570_v19 = vpop.permute.xlu0 %569 }
 0x19f   : > { %942 = vmatmul.mubr.msk.f32.vlgmr.msra.gmra.mrb[0].mxu1 %vm495_vm4, %v570_v19 }
 0x26e   : > { %v564_v43 = vpop.f32.mrb[0].mxu0 }
 0x26f   : > { %v565_v25 = vadd.f32 %v1281_v62, %v564_v43  ;;  %v932_v44 = vpop.f32.mrb[1].mxu0 }
 0x271   : > { %659 = vrot.lane.b32.xlu1 %v565_v25, %s1082_s6  ;;  %v643_v48 = vadd.f32 %v565_v25, %v476_v47 }
 0x272   : > { %v639_v32 = vpop.f32.mrb[0].mxu1 }
 0x273   : > { %v640_v45 = vadd.f32 %v1286_v63, %v639_v32  ;;  %v943_v46 = vpop.f32.mrb[1].mxu1  ;;  %v888_v50 = vmul.f32 -1.442695, %v643_v48 }
 0x275   : > { %661 = vrot.lane.b32.xlu1 %v640_v45, %s1082_s6  ;;  %v644_v51 = vadd.f32 %v640_v45, %v479_v49  ;;  %1001 = vpow2.f32 %v888_v50 }
 0x277   : > { %v889_v52 = vmul.f32 -1.442695, %v644_v51 }
 0x279   : > { %1003 = vpow2.f32 %v889_v52 }
 0x27f   : > { %v1002_v53 = vpop.eup %1001 }
 0x280   : > { %v651_v0 = vadd.f32 1.0, %v1002_v53 }
 0x282   : > { %1005 = vrcp.f32 %v651_v0 }
 0x283   : > { %v1004_v1 = vpop.eup %1003 }
 0x284   : > { %v652_v2 = vadd.f32 1.0, %v1004_v1 }
 0x286   : > { %1007 = vrcp.f32 %v652_v2 }
 0x28c   : > { %v1006_v3 = vpop.eup %1005 }
 0x28d   : > { %v679_v22 = vsub.f32 1.0, %v1006_v3  ;;  %v691_v24 = vmul.f32 %v1071_v7, %v1006_v3 }
 0x290   : > { %v1008_v11 = vpop.eup %1007 }
 0x291   : > { %v680_v27 = vsub.f32 1.0, %v1008_v11  ;;  %v692_v29 = vmul.f32 %v1067_v35, %v1008_v11 }
 0x2e3   : > { %v660_v4 = vpop.permute.xlu1 %659 }
 0x2e4   : > { %v665_v6 = vmul.f32 %v1006_v3, %v660_v4 }
 0x2e6   : > { %669 = vrot.lane.b32.xlu0 %v665_v6, %s1082_s6 }
 0x2e7   : > { %v662_v13 = vpop.permute.xlu1 %661 }
 0x2e8   : > { %v666_v14 = vmul.f32 %v1008_v11, %v662_v13 }
 0x2ea   : > { %671 = vrot.lane.b32.xlu1 %v666_v14, %s1082_s6 }
 0x358   : > { %v670_v15 = vpop.permute.xlu0 %669 }
 0x359   : > { %v675_v16 = vadd.f32 %v670_v15, %v476_v47 }
 0x35b   : > { %1009 = vtanh.f32 %v675_v16 }
 0x35c   : > { %v672_v17 = vpop.permute.xlu1 %671 }
 0x35d   : > { %v676_v18 = vadd.f32 %v672_v17, %v479_v49 }
 0x35f   : > { %1011 = vtanh.f32 %v676_v18 }
 0x365   : > { %v1010_v20 = vpop.eup %1009 }
 0x366   : > { %683 = vrot.lane.b32.xlu0 %v1010_v20, %s1079_s5 }
 0x369   : > { %v1012_v21 = vpop.eup %1011 }
 0x36a   : > { %685 = vrot.lane.b32.xlu1 %v1012_v21, %s1079_s5 }
 0x3d8   : > { %v684_v23 = vpop.permute.xlu0 %683 }
 0x3d9   : > { %v689_v26 = vmul.f32 %v684_v23, %v679_v22 }
 0x3db   : > { %v693_v7 = vadd.f32 %v691_v24, %v689_v26  }
 0x3dc   : > { %v686_v28 = vpop.permute.xlu1 %685 }
 0x3dd   : > { %v690_v30 = vmul.f32 %v686_v28, %v680_v27  ;;  %696 = vrot.lane.b32.xlu0 %v693_v7, %s1079_s5 }
 0x3df   : > { %v694_v35 = vadd.f32 %v692_v29, %v690_v30  }
 0x3e1   : > { %703 = vrot.lane.b32.xlu1 %v694_v35, %s1079_s5 }
 0x44e   :  { %469 = sbr.rel (!%p467_p0) target bundleno = 294 (0x126), region = 61 }
 0x44f   : > { %v697_v31 = vpop.permute.xlu0 %696 }
 0x450   : > { %701 = vst.msk [vmem:[%s699_s27] sm:$0x3] %vm700_vm5, %v697_v31 }
 0x453   : > { %v704_v33 = vpop.permute.xlu1 %703 }
 0x454   : > { %707 = vst.msk [vmem:[%s706_s28] sm:$0x3] %vm700_vm5, %v704_v33 }
 0x457   :  { %v1025_v43 = vld.sshfl [vmem:[#allocation4] sm:$0xf pattern:$0x76325410] }
 0x458   :  { %v1026_v25 = vld.sshfl [vmem:[#allocation4 + $0x2] sm:$0xf pattern:$0x76325410] }
 0x459   :  { %v1027_v54 = vld.sshfl [vmem:[#allocation4 + $0x8] sm:$0xf pattern:$0x76325410]  ;;  %v748_v56 = vcombine.low %v1025_v43, %v1026_v25 }
 0x45a   :  { %v1028_v55 = vld.sshfl [vmem:[#allocation4 + $0xa] sm:$0xf pattern:$0x76325410] }
 0x45b   :  { %v1021_v5 = vld.sshfl [vmem:[#allocation5] sm:$0xf pattern:$0x76325410]  ;;  %v756_v57 = vcombine.low %v1027_v54, %v1028_v55  ;;  %v755_v58 = vrot.slane %v748_v56, %v754_v40 }
 0x45c   :  { %v1022_v38 = vld.sshfl [vmem:[#allocation5 + $0x2] sm:$0xf pattern:$0x76325410] }
 0x45d   :  { %v1023_v39 = vld.sshfl [vmem:[#allocation5 + $0x8] sm:$0xf pattern:$0x76325410]  ;;  %v806_v9 = vcombine.low %v1021_v5, %v1022_v38  ;;  %v763_v59 = vrot.slane %v756_v57, %v754_v40 }
 0x45e   :  { %v1024_v8 = vld.sshfl [vmem:[#allocation5 + $0xa] sm:$0xf pattern:$0x76325410] }
 0x45f   :  { %v814_v41 = vcombine.low %v1023_v39, %v1024_v8  ;;  %v813_v12 = vrot.slane %v806_v9, %v754_v40  ;;  %v764_v60 = vcombine.low %v755_v58, %v763_v59  ;;  %v765_v62 = vcombine.high %v755_v58, %v763_v59 }
 0x461   :  { %v821_v42 = vrot.slane %v814_v41, %v754_v40 }
 0x463   :  { %v822_v19 = vcombine.low %v813_v12, %v821_v42  ;;  %v823_v7 = vcombine.high %v813_v12, %v821_v42 }
 0x465   :  { %826 = vrot.lane.b32.xlu0 %v822_v19, %s1084_s29 }
 0x469   :  { %828 = vrot.lane.b32.xlu0 %v823_v7, %s1084_s29 }
 0x4d7   :  { %v827_v10 = vpop.permute.xlu0 %826 }
 0x4d8   :  { %v833_v61 = vsel %vm495_vm4, %v764_v60, %v827_v10 }
 0x4d9   :  { %836 = vst.msk [vmem:[#allocation6] sm:$0xff] %vm835_vm6, %v833_v61 }
 0x4db   :  { %v829_v63 = vpop.permute.xlu0 %828 }
 0x4dc   :  { %v834_v35 = vsel %vm495_vm4, %v765_v62, %v829_v63 }
 0x4dd   :  { %837 = vst.msk [vmem:[#allocation6 + $0x8] sm:$0xff] %vm835_vm6, %v834_v35 }
 0x4de   :  { %1040 = shalt.err (!%p1037_p5)
}
 0x4df   :  { %s1041_s12 = scalar_lea.hbm %s1398_s7, 256 }
 0x4e0   :  { %p1042_p6 = scmp.ne.s32.totalorder %s1398_s7, %s1041_s12  ;;  %p1045_p7 = scmp.lt.u32.totalorder %s1041_s12, %s1398_s7 }
 0x4e2   :  { %p1047_p8 = pnand %p1045_p7, %p1042_p6 }
 0x4e4   :  { %1050 = shalt.err (!%p1047_p8)
}
 0x4e5   :  { %s1086_s3 = smov 128   ;;  %s1087_s17 = smov 8  }
 0x4e6   :  { %849 = dma.vmem_to_hbm [thread:$0]  %s844_s8, 256, %s1398_s7, [#allocation7], %s1086_s3, %s1086_s3, %s1087_s17  }
 0x4e7   :  { %1063 = dma.done.wait [#allocation7], 256  }
 0x4e8   :  { %1064 = vsyncadd [#allocation7], 4294967040 }
 0x4e9   :  { %853 = vsyncpa [#allocation7], 1 }

</bundles_post_ra>
